<compile_context>
chip_gen: v5e
topology: v5e:2x2
jax: 0.10.0
libtpu: 0.0.40
codegen_flags: <defaults>
</compile_context>

<pallas_src>
import functools

import jax
import jax.numpy as jnp
from jax import lax
from jax.experimental import pallas as pl
from jax.experimental.pallas import tpu as pltpu


def _round_up(x, m):
    return (x + m - 1) // m * m


# ----------------------------------------------------------------------------
# Fused kernel: all LSTM layers (recurrence only) + Linear + ReLU.
# ----------------------------------------------------------------------------
def _fused_lstm_kernel(gx0_ref, w_hh_ref, w_ih_ref, b_ref, w_lin_ref,
                       b_lin_ref, out_ref, y_sc, g_sc,
                       *, T, B, H, num_layers):
    """Single invocation (no grid), all operands whole-array resident in VMEM.

    gx0_ref:   (T*B, 4H) f32   layer-0 gate pre-activations  x @ W_ih0 + b0
    w_hh_ref:  (L, H, 4H) bf16 recurrent weights, all layers
    w_ih_ref:  (max(L-1,1), H, 4H) bf16 input weights for layers 1..L-1
    b_ref:     (max(L-1,1), 1, 4H) f32 fused biases for layers 1..L-1
    w_lin_ref: (H, P) bf16, b_lin_ref: (1, P) f32
    out_ref:   (B, P) f32
    y_sc:      (T*B, H)  f32 scratch  (hidden sequence of the current layer)
    g_sc:      (T*B, 4H) f32 scratch  (gate pre-activations of layers >= 1)
    """
    # Per-lane scale folding sigmoid into a single full-width tanh:
    # columns of the g gate get 1.0, the i/f/o gates get 0.5.
    col = lax.broadcasted_iota(jnp.int32, (1, 4 * H), 1)
    is_g = jnp.logical_and(col >= 2 * H, col < 3 * H)
    gate_scale = jnp.where(is_g, 1.0, 0.5).astype(jnp.float32)      # (1, 4H)

    def run_layer(gates_ref, w_hh_l, write_y):
        # gates_ref: (T*B, 4H) f32 ref of precomputed x-side gate inputs.
        # w_hh_l:    (H, 4H) bf16 value (loaded once, loop-invariant).
        def step(t, carry):
            h, c = carry
            row = pl.multiple_of(t * B, B)
            gx = gates_ref[pl.ds(row, B), :]                         # (B, 4H)
            gates = gx + jnp.dot(h.astype(jnp.bfloat16), w_hh_l,
                                 preferred_element_type=jnp.float32)
            # One EUP pass over the whole (B, 4H) slab;
            # sigmoid(x) = 0.5*tanh(0.5*x) + 0.5 for the i/f/o gates.
            tz = jnp.tanh(gates * gate_scale)
            # NOTE: with H a multiple of 128 (production sizes) these slices
            # are lane-aligned and free; at H=32 they stay inside one vreg.
            i_g = 0.5 * tz[:, 0 * H:1 * H] + 0.5
            f_g = 0.5 * tz[:, 1 * H:2 * H] + 0.5
            g_g = tz[:, 2 * H:3 * H]
            o_g = 0.5 * tz[:, 3 * H:4 * H] + 0.5
            c_new = f_g * c + i_g * g_g
            h_new = o_g * jnp.tanh(c_new)
            if write_y:
                y_sc[pl.ds(row, B), :] = h_new
            return h_new, c_new

        h0 = jnp.zeros((B, H), jnp.float32)
        c0 = jnp.zeros((B, H), jnp.float32)
        h_T, _ = lax.fori_loop(0, T, step, (h0, c0))
        return h_T

    # Layer 0: x-side gates were precomputed outside the kernel.
    h_T = run_layer(gx0_ref, w_hh_ref[0], write_y=num_layers > 1)

    # Layers 1..L-1: hoisted input projection = one big MXU matmul over all T,
    # then the recurrence.  (Python loop unrolls; num_layers is static.)
    for l in range(1, num_layers):
        g_sc[...] = (jnp.dot(y_sc[...].astype(jnp.bfloat16), w_ih_ref[l - 1],
                             preferred_element_type=jnp.float32)
                     + b_ref[l - 1])
        h_T = run_layer(g_sc, w_hh_ref[l], write_y=l < num_layers - 1)

    # Fused final Linear + ReLU on hidden[-1]  (lane-dense padded P).
    y = (jnp.dot(h_T.astype(jnp.bfloat16), w_lin_ref[...],
                 preferred_element_type=jnp.float32) + b_lin_ref[...])
    out_ref[...] = jnp.maximum(y, 0.0)


# ----------------------------------------------------------------------------
# Parameter init (PyTorch-style uniform, pre-transposed, fused bias).
# ----------------------------------------------------------------------------
def init_params(key, input_dim, lstm_dim, proj_dim, num_lstm_layers):
    params = {"lstm": [], "linear": {}}
    k = 1.0 / jnp.sqrt(lstm_dim)
    for layer in range(num_lstm_layers):
        d_in = input_dim if layer == 0 else lstm_dim
        key, k1, k2, k3, k4 = jax.random.split(key, 5)
        w_ih = jax.random.uniform(k1, (d_in, 4 * lstm_dim), jnp.float32, -k, k)
        w_hh = jax.random.uniform(k2, (lstm_dim, 4 * lstm_dim), jnp.float32, -k, k)
        b_ih = jax.random.uniform(k3, (4 * lstm_dim,), jnp.float32, -k, k)
        b_hh = jax.random.uniform(k4, (4 * lstm_dim,), jnp.float32, -k, k)
        params["lstm"].append(
            {"w_ih": w_ih, "w_hh": w_hh, "b": (b_ih + b_hh)[None, :]})
    key, k1, k2 = jax.random.split(key, 3)
    params["linear"]["w"] = jax.random.uniform(
        k1, (lstm_dim, proj_dim), jnp.float32, -k, k)
    params["linear"]["b"] = jax.random.uniform(
        k2, (1, proj_dim), jnp.float32, -k, k)
    return params


# ----------------------------------------------------------------------------
# Forward wrapper.
# ----------------------------------------------------------------------------
@jax.jit
def lstm_without_projection_forward(params, x_btd):
    # x_btd: (B, T, D) batch_first, same layout as the PyTorch module input.
    lstm_ps = params["lstm"]
    num_layers = len(lstm_ps)
    B, T, D = x_btd.shape
    H = lstm_ps[0]["w_hh"].shape[0]
    P = params["linear"]["w"].shape[1]

    B_pad = _round_up(max(B, 8), 8)        # f32 sublane multiple
    P_pad = _round_up(max(P, 128), 128)    # lane-dense final store

    # Hoisted layer-0 input projection: one (T*B_pad, D) x (D, 4H) matmul.
    x = jnp.transpose(x_btd.astype(jnp.float32), (1, 0, 2))    # (T, B, D)
    x = jnp.pad(x, ((0, 0), (0, B_pad - B), (0, 0)))           # (T, B_pad, D)
    x2d = x.reshape(T * B_pad, D)
    gx0 = (jnp.dot(x2d.astype(jnp.bfloat16),
                   lstm_ps[0]["w_ih"].astype(jnp.bfloat16),
                   preferred_element_type=jnp.float32)
           + lstm_ps[0]["b"])                                   # (T*B_pad, 4H)

    # Stacked / cast / padded weights for the fused kernel.
    w_hh_all = jnp.stack([p["w_hh"] for p in lstm_ps]).astype(jnp.bfloat16)
    if num_layers > 1:
        w_ih_rest = jnp.stack(
            [p["w_ih"] for p in lstm_ps[1:]]).astype(jnp.bfloat16)
        b_rest = jnp.stack([p["b"] for p in lstm_ps[1:]])
    else:
        w_ih_rest = jnp.zeros((1, H, 4 * H), jnp.bfloat16)      # unused dummy
        b_rest = jnp.zeros((1, 1, 4 * H), jnp.float32)          # unused dummy
    w_lin = jnp.zeros((H, P_pad), jnp.float32).at[:, :P].set(
        params["linear"]["w"]).astype(jnp.bfloat16)
    b_lin = jnp.zeros((1, P_pad), jnp.float32).at[:, :P].set(
        params["linear"]["b"])

    # Explicit VMEM budget (tiny here; matters at production sizes).
    vmem_bytes = (gx0.size * 4 + w_hh_all.size * 2 + w_ih_rest.size * 2
                  + b_rest.size * 4 + w_lin.size * 2 + b_lin.size * 4
                  + B_pad * P_pad * 4
                  + T * B_pad * H * 4 + T * B_pad * 4 * H * 4)
    vmem_limit = int(min(max(2 * vmem_bytes, 32 * 2 ** 20), 100 * 2 ** 20))

    out = pl.pallas_call(
        functools.partial(_fused_lstm_kernel, T=T, B=B_pad, H=H,
                          num_layers=num_layers),
        out_shape=jax.ShapeDtypeStruct((B_pad, P_pad), jnp.float32),
        scratch_shapes=[
            pltpu.VMEM((T * B_pad, H), jnp.float32),       # hidden sequence
            pltpu.VMEM((T * B_pad, 4 * H), jnp.float32),   # gates, layers >= 1
        ],
        compiler_params=pltpu.CompilerParams(vmem_limit_bytes=vmem_limit),
    )(gx0, w_hh_all, w_ih_rest, b_rest, w_lin, b_lin)

    return out[:B, :P]


# ----------------------------------------------------------------------------
# Pure-JAX reference (PyTorch semantics; mirrors the kernel's bf16 matmul
# operand casting so the check isolates kernel correctness).
# ----------------------------------------------------------------------------
def _reference_forward(params, x_btd):
    x = jnp.transpose(x_btd.astype(jnp.float32), (1, 0, 2))    # (T, B, D)
    h_last = None
    for lp in params["lstm"]:
        Bv = x.shape[1]
        H = lp["w_hh"].shape[0]
        w_ih = lp["w_ih"].astype(jnp.bfloat16)
        w_hh = lp["w_hh"].astype(jnp.bfloat16)
        b = lp["b"]

        def step(carry, x_t, w_ih=w_ih, w_hh=w_hh, b=b, H=H):
            h, c = carry
            gates = (jnp.dot(x_t.astype(jnp.bfloat16), w_ih,
                             preferred_element_type=jnp.float32)
                     + jnp.dot(h.astype(jnp.bfloat16), w_hh,
                               preferred_element_type=jnp.float32) + b)
            i = jax.nn.sigmoid(gates[:, 0 * H:1 * H])
            f = jax.nn.sigmoid(gates[:, 1 * H:2 * H])
            g = jnp.tanh(gates[:, 2 * H:3 * H])
            o = jax.nn.sigmoid(gates[:, 3 * H:4 * H])
            c = f * c + i * g
            h = o * jnp.tanh(c)
            return (h, c), h

        h0 = jnp.zeros((Bv, H), jnp.float32)
        c0 = jnp.zeros((Bv, H), jnp.float32)
        (h_last, _), x = lax.scan(step, (h0, c0), x)
    y = (jnp.dot(h_last.astype(jnp.bfloat16),
                 params["linear"]["w"].astype(jnp.bfloat16),
                 preferred_element_type=jnp.float32)
         + params["linear"]["b"])
    return jnp.maximum(y, 0.0)


if __name__ == "__main__":
    B, T = 2, 8
    input_dim, lstm_dim, proj_dim, num_layers = 16, 32, 16, 2

    key = jax.random.PRNGKey(0)
    key, xkey = jax.random.split(key)
    x = jax.random.normal(xkey, (B, T, input_dim), dtype=jnp.float32)

    params = init_params(key, input_dim, lstm_dim, proj_dim, num_layers)

    out = lstm_without_projection_forward(params, x)
    out = jax.block_until_ready(out)

    ref = _reference_forward(params, x)
    assert out.shape == (B, proj_dim), out.shape
    assert jnp.allclose(out, ref, rtol=5e-3, atol=5e-3), (
        float(jnp.max(jnp.abs(out - ref))))

    print("KERNEL_OK")
</pallas_src>

<mosaic_0001>
module attributes {stable_mosaic.version = 11 : i64} {
  func.func @_fused_lstm_kernel(%arg0: memref<64x128xf32, #tpu.memory_space<vmem>>, %arg1: memref<2x32x128xbf16, #tpu.memory_space<vmem>>, %arg2: memref<1x32x128xbf16, #tpu.memory_space<vmem>>, %arg3: memref<1x1x128xf32, #tpu.memory_space<vmem>>, %arg4: memref<32x128xbf16, #tpu.memory_space<vmem>>, %arg5: memref<1x128xf32, #tpu.memory_space<vmem>>, %arg6: memref<8x128xf32, #tpu.memory_space<vmem>>, %arg7: memref<64x32xf32, #tpu.memory_space<vmem>>, %arg8: memref<64x128xf32, #tpu.memory_space<vmem>>) attributes {dimension_semantics = [], scalar_prefetch = 0 : i64, scratch_operands = 2 : i64, tpu.core_type = #tpu.core_type<tc>} {
    %0 = tpu.iota {dimensions = array<i32: 1>} : vector<1x128xi32>
    %c64_i32 = arith.constant 64 : i32
    %1 = vector.broadcast %c64_i32 : i32 to vector<1x128xi32>
    %2 = arith.cmpi sge, %0, %1 : vector<1x128xi32>
    %c96_i32 = arith.constant 96 : i32
    %3 = vector.broadcast %c96_i32 : i32 to vector<1x128xi32>
    %4 = arith.cmpi slt, %0, %3 : vector<1x128xi32>
    %5 = arith.andi %2, %4 : vector<1x128xi1>
    %cst = arith.constant 1.000000e+00 : f32
    %cst_0 = arith.constant 5.000000e-01 : f32
    %6 = vector.broadcast %cst : f32 to vector<1x128xf32>
    %7 = vector.broadcast %cst_0 : f32 to vector<1x128xf32>
    %8 = arith.select %5, %6, %7 : vector<1x128xi1>, vector<1x128xf32>
    %c0 = arith.constant 0 : index
    %c0_1 = arith.constant 0 : index
    %c0_2 = arith.constant 0 : index
    %9 = vector.load %arg1[%c0, %c0_1, %c0_2] : memref<2x32x128xbf16, #tpu.memory_space<vmem>>, vector<1x32x128xbf16>
    %10 = vector.shape_cast %9 : vector<1x32x128xbf16> to vector<32x128xbf16>
    %cst_3 = arith.constant 0.000000e+00 : f32
    %11 = vector.broadcast %cst_3 : f32 to vector<8x32xf32>
    %cst_4 = arith.constant 0.000000e+00 : f32
    %12 = vector.broadcast %cst_4 : f32 to vector<8x32xf32>
    %c0_i32 = arith.constant 0 : i32
    %c8_i32 = arith.constant 8 : i32
    %13 = arith.addi %c0_i32, %c8_i32 : i32
    %c1_i32 = arith.constant 1 : i32
    %14:2 = scf.for %arg9 = %c0_i32 to %13 step %c1_i32 iter_args(%arg10 = %11, %arg11 = %12) -> (vector<8x32xf32>, vector<8x32xf32>)  : i32 {
      %c8_i32_33 = arith.constant 8 : i32
      %40 = arith.muli %arg9, %c8_i32_33 : i32
      %41 = tpu.assume_multiple %40, 8 : i32
      %42 = arith.index_cast %41 : i32 to index
      %c0_34 = arith.constant 0 : index
      %43 = vector.load %arg0[%42, %c0_34] : memref<64x128xf32, #tpu.memory_space<vmem>>, vector<8x128xf32>
      %44 = arith.truncf %arg10 : vector<8x32xf32> to vector<8x32xbf16>
      %cst_35 = arith.constant dense<0.000000e+00> : vector<8x128xf32>
      %45 = tpu.matmul %44, %10, %cst_35 {dimension_numbers = #tpu.dot_dimension_numbers<[1], [0], [0], [1], [0, 0, 1, 1], [], []>} : vector<8x32xbf16>, vector<32x128xbf16>, vector<8x128xf32> -> vector<8x128xf32>
      %46 = arith.addf %43, %45 : vector<8x128xf32>
      %47 = vector.broadcast %8 : vector<1x128xf32> to vector<8x128xf32>
      %48 = arith.mulf %46, %47 : vector<8x128xf32>
      %49 = math.tanh %48 : vector<8x128xf32>
      %50 = vector.extract_strided_slice %49 {offsets = [0, 0], sizes = [8, 32], strides = [1, 1]} : vector<8x128xf32> to vector<8x32xf32>
      %cst_36 = arith.constant 5.000000e-01 : f32
      %51 = vector.broadcast %cst_36 : f32 to vector<8x32xf32>
      %52 = arith.mulf %51, %50 : vector<8x32xf32>
      %cst_37 = arith.constant 5.000000e-01 : f32
      %53 = vector.broadcast %cst_37 : f32 to vector<8x32xf32>
      %54 = arith.addf %52, %53 : vector<8x32xf32>
      %55 = vector.extract_strided_slice %49 {offsets = [0, 32], sizes = [8, 32], strides = [1, 1]} : vector<8x128xf32> to vector<8x32xf32>
      %cst_38 = arith.constant 5.000000e-01 : f32
      %56 = vector.broadcast %cst_38 : f32 to vector<8x32xf32>
      %57 = arith.mulf %56, %55 : vector<8x32xf32>
      %cst_39 = arith.constant 5.000000e-01 : f32
      %58 = vector.broadcast %cst_39 : f32 to vector<8x32xf32>
      %59 = arith.addf %57, %58 : vector<8x32xf32>
      %60 = vector.extract_strided_slice %49 {offsets = [0, 64], sizes = [8, 32], strides = [1, 1]} : vector<8x128xf32> to vector<8x32xf32>
      %61 = vector.extract_strided_slice %49 {offsets = [0, 96], sizes = [8, 32], strides = [1, 1]} : vector<8x128xf32> to vector<8x32xf32>
      %cst_40 = arith.constant 5.000000e-01 : f32
      %62 = vector.broadcast %cst_40 : f32 to vector<8x32xf32>
      %63 = arith.mulf %62, %61 : vector<8x32xf32>
      %cst_41 = arith.constant 5.000000e-01 : f32
      %64 = vector.broadcast %cst_41 : f32 to vector<8x32xf32>
      %65 = arith.addf %63, %64 : vector<8x32xf32>
      %66 = arith.mulf %59, %arg11 : vector<8x32xf32>
      %67 = arith.mulf %54, %60 : vector<8x32xf32>
      %68 = arith.addf %66, %67 : vector<8x32xf32>
      %69 = math.tanh %68 : vector<8x32xf32>
      %70 = arith.mulf %65, %69 : vector<8x32xf32>
      %71 = arith.index_cast %41 : i32 to index
      %c0_42 = arith.constant 0 : index
      %72 = vector.load %arg7[%71, %c0_42] : memref<64x32xf32, #tpu.memory_space<vmem>>, vector<8x32xf32>
      tpu.vector_store %arg7[%71, %c0_42], %70 {strides = array<i32>} : memref<64x32xf32, #tpu.memory_space<vmem>>, vector<8x32xf32>,
      scf.yield %70, %68 : vector<8x32xf32>, vector<8x32xf32>
    }
    %c8_i32_5 = arith.constant 8 : i32
    %c0_6 = arith.constant 0 : index
    %c0_7 = arith.constant 0 : index
    %15 = vector.load %arg7[%c0_6, %c0_7] : memref<64x32xf32, #tpu.memory_space<vmem>>, vector<64x32xf32>
    %16 = arith.truncf %15 : vector<64x32xf32> to vector<64x32xbf16>
    %c0_8 = arith.constant 0 : index
    %c0_9 = arith.constant 0 : index
    %c0_10 = arith.constant 0 : index
    %17 = vector.load %arg2[%c0_8, %c0_9, %c0_10] : memref<1x32x128xbf16, #tpu.memory_space<vmem>>, vector<1x32x128xbf16>
    %18 = vector.shape_cast %17 : vector<1x32x128xbf16> to vector<32x128xbf16>
    %cst_11 = arith.constant dense<0.000000e+00> : vector<64x128xf32>
    %19 = tpu.matmul %16, %18, %cst_11 {dimension_numbers = #tpu.dot_dimension_numbers<[1], [0], [0], [1], [0, 0, 1, 1], [], []>} : vector<64x32xbf16>, vector<32x128xbf16>, vector<64x128xf32> -> vector<64x128xf32>
    %c0_12 = arith.constant 0 : index
    %c0_13 = arith.constant 0 : index
    %c0_14 = arith.constant 0 : index
    %20 = vector.load %arg3[%c0_12, %c0_13, %c0_14] : memref<1x1x128xf32, #tpu.memory_space<vmem>>, vector<1x1x128xf32>
    %21 = vector.shape_cast %20 : vector<1x1x128xf32> to vector<1x128xf32>
    %22 = vector.broadcast %21 : vector<1x128xf32> to vector<64x128xf32>
    %23 = arith.addf %19, %22 : vector<64x128xf32>
    %c0_15 = arith.constant 0 : index
    %c0_16 = arith.constant 0 : index
    %24 = vector.load %arg8[%c0_15, %c0_16] : memref<64x128xf32, #tpu.memory_space<vmem>>, vector<64x128xf32>
    tpu.vector_store %arg8[%c0_15, %c0_16], %23 {strides = array<i32>} : memref<64x128xf32, #tpu.memory_space<vmem>>, vector<64x128xf32>,
    %c1 = arith.constant 1 : index
    %c0_17 = arith.constant 0 : index
    %c0_18 = arith.constant 0 : index
    %25 = vector.load %arg1[%c1, %c0_17, %c0_18] : memref<2x32x128xbf16, #tpu.memory_space<vmem>>, vector<1x32x128xbf16>
    %26 = vector.shape_cast %25 : vector<1x32x128xbf16> to vector<32x128xbf16>
    %cst_19 = arith.constant 0.000000e+00 : f32
    %27 = vector.broadcast %cst_19 : f32 to vector<8x32xf32>
    %cst_20 = arith.constant 0.000000e+00 : f32
    %28 = vector.broadcast %cst_20 : f32 to vector<8x32xf32>
    %c0_i32_21 = arith.constant 0 : i32
    %c8_i32_22 = arith.constant 8 : i32
    %29 = arith.addi %c0_i32_21, %c8_i32_22 : i32
    %c1_i32_23 = arith.constant 1 : i32
    %30:2 = scf.for %arg9 = %c0_i32_21 to %29 step %c1_i32_23 iter_args(%arg10 = %27, %arg11 = %28) -> (vector<8x32xf32>, vector<8x32xf32>)  : i32 {
      %c8_i32_33 = arith.constant 8 : i32
      %40 = arith.muli %arg9, %c8_i32_33 : i32
      %41 = tpu.assume_multiple %40, 8 : i32
      %42 = arith.index_cast %41 : i32 to index
      %c0_34 = arith.constant 0 : index
      %43 = vector.load %arg8[%42, %c0_34] : memref<64x128xf32, #tpu.memory_space<vmem>>, vector<8x128xf32>
      %44 = arith.truncf %arg10 : vector<8x32xf32> to vector<8x32xbf16>
      %cst_35 = arith.constant dense<0.000000e+00> : vector<8x128xf32>
      %45 = tpu.matmul %44, %26, %cst_35 {dimension_numbers = #tpu.dot_dimension_numbers<[1], [0], [0], [1], [0, 0, 1, 1], [], []>} : vector<8x32xbf16>, vector<32x128xbf16>, vector<8x128xf32> -> vector<8x128xf32>
      %46 = arith.addf %43, %45 : vector<8x128xf32>
      %47 = vector.broadcast %8 : vector<1x128xf32> to vector<8x128xf32>
      %48 = arith.mulf %46, %47 : vector<8x128xf32>
      %49 = math.tanh %48 : vector<8x128xf32>
      %50 = vector.extract_strided_slice %49 {offsets = [0, 0], sizes = [8, 32], strides = [1, 1]} : vector<8x128xf32> to vector<8x32xf32>
      %cst_36 = arith.constant 5.000000e-01 : f32
      %51 = vector.broadcast %cst_36 : f32 to vector<8x32xf32>
      %52 = arith.mulf %51, %50 : vector<8x32xf32>
      %cst_37 = arith.constant 5.000000e-01 : f32
      %53 = vector.broadcast %cst_37 : f32 to vector<8x32xf32>
      %54 = arith.addf %52, %53 : vector<8x32xf32>
      %55 = vector.extract_strided_slice %49 {offsets = [0, 32], sizes = [8, 32], strides = [1, 1]} : vector<8x128xf32> to vector<8x32xf32>
      %cst_38 = arith.constant 5.000000e-01 : f32
      %56 = vector.broadcast %cst_38 : f32 to vector<8x32xf32>
      %57 = arith.mulf %56, %55 : vector<8x32xf32>
      %cst_39 = arith.constant 5.000000e-01 : f32
      %58 = vector.broadcast %cst_39 : f32 to vector<8x32xf32>
      %59 = arith.addf %57, %58 : vector<8x32xf32>
      %60 = vector.extract_strided_slice %49 {offsets = [0, 64], sizes = [8, 32], strides = [1, 1]} : vector<8x128xf32> to vector<8x32xf32>
      %61 = vector.extract_strided_slice %49 {offsets = [0, 96], sizes = [8, 32], strides = [1, 1]} : vector<8x128xf32> to vector<8x32xf32>
      %cst_40 = arith.constant 5.000000e-01 : f32
      %62 = vector.broadcast %cst_40 : f32 to vector<8x32xf32>
      %63 = arith.mulf %62, %61 : vector<8x32xf32>
      %cst_41 = arith.constant 5.000000e-01 : f32
      %64 = vector.broadcast %cst_41 : f32 to vector<8x32xf32>
      %65 = arith.addf %63, %64 : vector<8x32xf32>
      %66 = arith.mulf %59, %arg11 : vector<8x32xf32>
      %67 = arith.mulf %54, %60 : vector<8x32xf32>
      %68 = arith.addf %66, %67 : vector<8x32xf32>
      %69 = math.tanh %68 : vector<8x32xf32>
      %70 = arith.mulf %65, %69 : vector<8x32xf32>
      scf.yield %70, %68 : vector<8x32xf32>, vector<8x32xf32>
    }
    %c8_i32_24 = arith.constant 8 : i32
    %31 = arith.truncf %30#0 : vector<8x32xf32> to vector<8x32xbf16>
    %c0_25 = arith.constant 0 : index
    %c0_26 = arith.constant 0 : index
    %32 = vector.load %arg4[%c0_25, %c0_26] : memref<32x128xbf16, #tpu.memory_space<vmem>>, vector<32x128xbf16>
    %cst_27 = arith.constant dense<0.000000e+00> : vector<8x128xf32>
    %33 = tpu.matmul %31, %32, %cst_27 {dimension_numbers = #tpu.dot_dimension_numbers<[1], [0], [0], [1], [0, 0, 1, 1], [], []>} : vector<8x32xbf16>, vector<32x128xbf16>, vector<8x128xf32> -> vector<8x128xf32>
    %c0_28 = arith.constant 0 : index
    %c0_29 = arith.constant 0 : index
    %34 = vector.load %arg5[%c0_28, %c0_29] : memref<1x128xf32, #tpu.memory_space<vmem>>, vector<1x128xf32>
    %35 = vector.broadcast %34 : vector<1x128xf32> to vector<8x128xf32>
    %36 = arith.addf %33, %35 : vector<8x128xf32>
    %cst_30 = arith.constant 0.000000e+00 : f32
    %37 = vector.broadcast %cst_30 : f32 to vector<8x128xf32>
    %38 = arith.maximumf %36, %37 : vector<8x128xf32>
    %c0_31 = arith.constant 0 : index
    %c0_32 = arith.constant 0 : index
    %39 = vector.load %arg6[%c0_31, %c0_32] : memref<8x128xf32, #tpu.memory_space<vmem>>, vector<8x128xf32>
    tpu.vector_store %arg6[%c0_31, %c0_32], %38 {strides = array<i32>} : memref<8x128xf32, #tpu.memory_space<vmem>>, vector<8x128xf32>,
    return
  }
}

</mosaic_0001>

<bundles_post_ra>
// kernel: lstm_without_projection_forward.1
= control target key start
LH: loop header
LB: loop body
LE: loop exit
PB: predicated region body
PF: predicated region fallthrough
CT: control target
= control target key end

     0   :  { %v24_v0 = vlaneseq  ;;  %v503_v6 = vmov 0.5   ;;  %v479_v8 = vmov 0.0   ;;  %v483_v9 = vmov 0.0   ;;  %s558_s29 = smov 0   ;;  %s634_s0 = inlined_call_operand.vmem [shape: f32[64,128], index: 0, kind: input, shape index: {}]   ;;  %s635_s1 = inlined_call_operand.vmem [shape: bf16[2,32,128], index: 1, kind: input, shape index: {}]   ;;  %s636_s2 = inlined_call_operand.vmem [shape: bf16[1,32,128], index: 2, kind: input, shape index: {}]   ;;  %s637_s3 = inlined_call_operand.vmem [shape: f32[1,1,128], index: 3, kind: input, shape index: {}]   ;;  %s638_s4 = inlined_call_operand.vmem [shape: bf16[32,128], index: 4, kind: input, shape index: {}]   ;;  %s639_s5 = inlined_call_operand.vmem [shape: f32[1,128], index: 5, kind: input, shape index: {}]   ;;  %s640_s6 = inlined_call_operand.vmem [shape: f32[8,128], index: 6, kind: output, shape index: {}]  }
   0x1   :  { %v335_v1 = vld [vmem:[%s635_s1] sm:$0xf]  ;;  %v377_v2 = vld [vmem:[%s635_s1] sm:$0xf0]  ;;  %v339_v3 = vld [vmem:[%s635_s1 + $0x8] sm:$0xf] }
   0x2   :  { %v25_v4 = vand.u32 127, %v24_v0  ;;  %v378_v5 = vld [vmem:[%s635_s1 + $0x8] sm:$0xf0] }
   0x4   :  { %vm26_vm0 = vcmp.ge.s32.totalorder %v25_v4, 64  ;;  %vm27_vm1 = vcmp.lt.s32.totalorder %v25_v4, 96 }
   0x5   :  { %vm28_vm2 = vmand %vm26_vm0, %vm27_vm1 }
   0x6   :  { %v556_v7 = vsel %vm28_vm2, 1.0, %v503_v6 }
   0x7 LB: > { %v340_v10 = vor.u32 %v378_v5, %v339_v3  ;;  %v45_v11 = vpack.c.bf16 %v485_v9, %v485_v9  ;;  %v336_v12 = vor.u32 %v377_v2, %v335_v1  ;;  %s504_s30 = smov 32   ;;  %vm61_vm3 = vcmask 261120   ;;  %s332_s7 = sshll.u32 %s489_s29, 3  ;;  %s489_s29 = sphi %s558_s29, %s39_s29   ;;  %v485_v9 = vphi %v483_v9, %v99_v9   ;;  %v481_v8 = vphi %v479_v8, %v93_v8  }
   0x8   : > { %s43_s10 = scalar_lea.vmem %s634_s0, %s332_s7  ;;  %s505_s11 = smov 64  }
   0x9   : > { %71 = vmatpush.bf16.msra.mxu0 %v340_v10  ;;  %47 = vrot.lane.b32.xlu0 %v45_v11, %s504_s30  ;;  %v44_v14 = vld [vmem:[%s43_s10] sm:$0xff]  ;;  %s104_s12 = scalar_lea.vmem [#allocation2], %s332_s7  ;;  %s39_s29 = sadd.s32 1, %s489_s29  }
   0xa   : > { %p36_p0 = scmp.ge.s32.totalorder %s39_s29, 8  }
   0xb   :  { %v380_v29 = vld [vmem:[%s636_s2 + $0x8] sm:$0xff] (%p36_p0)  ;;  %v379_v30 = vld [vmem:[%s636_s2] sm:$0xff] (%p36_p0)  ;;  %v586_v43 = vld [vmem:[%s635_s1 + $0x10] sm:$0xf] (%p36_p0)  ;;  %v491_v0 = vmov (%p36_p0), 0.0   ;;  %v495_v1 = vmov (%p36_p0), 0.0  }
   0xc   :  { %385 = vmatpush.bf16.msra.mxu1 (%p36_p0), %v380_v29  ;;  %386 = vmatpush.bf16.msra.mxu2 (%p36_p0), %v380_v29  ;;  %v591_v44 = vld [vmem:[%s635_s1 + $0x10] sm:$0xf0] (%p36_p0)  ;;  %v596_v45 = vld [vmem:[%s635_s1 + $0x18] sm:$0xf] (%p36_p0)  ;;  %v601_v46 = vld [vmem:[%s635_s1 + $0x18] sm:$0xf0] (%p36_p0) }
   0xd   : > { %72 = vmatpush.bf16.msra.mxu0 %v336_v12  ;;  %387 = vmatpush.bf16.msra.mxu3 (%p36_p0), %v380_v29  ;;  %v449_v47 = vld [vmem:[%s637_s3] ss:$0 sm:$0xff] (%p36_p0)  ;;  %s606_s1 = smov (%p36_p0), 0  }
  0x10   :  { %388 = vmatpush.bf16.msra.mxu1 (%p36_p0), %v379_v30  ;;  %389 = vmatpush.bf16.msra.mxu2 (%p36_p0), %v379_v30 }
  0x11   :  { %390 = vmatpush.bf16.msra.mxu3 (%p36_p0), %v379_v30 }
  0x7b   : > { %v48_v13 = vpop.permute.xlu0 %47 }
  0x7c   : > { %341 = vmatmul.msk.bf16.vlgmr.msra.gmra.mxu0 %vm61_vm3, %v48_v13 }
  0x7d   :  { %157 = vmatpush.bf16.msra.mxu0 (%p36_p0), %v380_v29 }
  0x81   :  { %158 = vmatpush.bf16.msra.mxu0 (%p36_p0), %v379_v30 }
  0xf9   : > { %v74_v15 = vpop.f32.mrf.mxu0 }
  0xfa   : > { %v78_v16 = vadd.f32 %v74_v15, %v44_v14 }
  0xfc   : > { %v79_v17 = vmul.f32 %v78_v16, %v556_v7 }
  0xfe   : > { %445 = vtanh.f32 %v79_v17 }
 0x101   : > { %v76_v18 = vpop.f32.mrf.mxu0 }
 0x104   : > { %v446_v19 = vpop.eup %445 }
 0x105   : > { %85 = vrot.lane.b32.xlu0 %v446_v19, %s505_s11  ;;  %v81_v20 = vmul.f32 0.5, %v446_v19 }
 0x107   : > { %v82_v21 = vadd.f32 0.5, %v81_v20 }
 0x109   : > { %v83_v24 = vmul.f32 %v481_v8, %v82_v21 }
 0x177   : > { %v86_v22 = vpop.permute.xlu0 %85 }
 0x178   : > { %v88_v23 = vmul.f32 %v86_v22, %v82_v21 }
 0x17a   : > { %90 = vrot.lane.b32.xlu1 %v88_v23, %s504_s30 }
 0x1ec   : > { %v91_v25 = vpop.permute.xlu1 %90 }
 0x1ed   : > { %v93_v8 = vadd.f32 %v91_v25, %v83_v24  }
 0x1ef   : > { %447 = vtanh.f32 %v93_v8 }
 0x1f5   : > { %v448_v26 = vpop.eup %447 }
 0x1f6   : > { %96 = vrot.lane.b32.xlu1 %v448_v26, %s505_s11 }
 0x268   : > { %v97_v27 = vpop.permute.xlu1 %96 }
 0x269   : > { %v99_v9 = vmul.f32 %v97_v27, %v82_v21  }
 0x26b   : > { %101 = vrot.lane.b32.xlu2 %v99_v9, %s504_s30 }
 0x2c2   :  { %38 = sbr.rel (!%p36_p0) target bundleno = 7 (0x7), region = 62 }
 0x2c5   : > { %v102_v28 = vpop.permute.xlu2 %101 }
 0x2c6   : > { %105 = vst.msk [vmem:[%s104_s12] sm:$0xff] %vm61_vm3, %v102_v28 }
 0x2cd   :  { %v106_v31 = vld [vmem:[#allocation2] sm:$0xff]  ;;  %v107_v32 = vld [vmem:[#allocation2 + $0x8] sm:$0xff]  ;;  %v108_v33 = vld [vmem:[#allocation2 + $0x10] sm:$0xff] }
 0x2ce   :  { %v109_v34 = vld [vmem:[#allocation2 + $0x18] sm:$0xff]  ;;  %v110_v35 = vld [vmem:[#allocation2 + $0x20] sm:$0xff]  ;;  %v111_v36 = vld [vmem:[#allocation2 + $0x28] sm:$0xff]  ;;  %v114_v39 = vpack.c.bf16 %v107_v32, %v106_v31 }
 0x2cf   :  { %v112_v37 = vld [vmem:[#allocation2 + $0x30] sm:$0xff]  ;;  %v113_v38 = vld [vmem:[#allocation2 + $0x38] sm:$0xff]  ;;  %v115_v40 = vpack.c.bf16 %v109_v34, %v108_v33  ;;  %v116_v41 = vpack.c.bf16 %v111_v36, %v110_v35 }
 0x2d0   :  { %v117_v42 = vpack.c.bf16 %v113_v38, %v112_v37  ;;  %350 = vmatmul.msk.bf16.vlgmr.msra.gmra.mxu0 %vm61_vm3, %v114_v39 }
 0x2d1   :  { %351 = vmatmul.msk.bf16.vlgmr.msra.gmra.mxu1 %vm61_vm3, %v115_v40  ;;  %352 = vmatmul.msk.bf16.vlgmr.msra.gmra.mxu2 %vm61_vm3, %v116_v41 }
 0x2d2   :  { %353 = vmatmul.msk.bf16.vlgmr.msra.gmra.mxu3 %vm61_vm3, %v117_v42 }
 0x34d   :  { %v160_v48 = vpop.f32.mrf.mxu0 }
 0x34e   :  { %v165_v49 = vpop.f32.mrf.mxu1  ;;  %v161_v50 = vadd.f32 %v449_v47, %v160_v48 }
 0x34f   :  { %v166_v51 = vadd.f32 %v449_v47, %v165_v49 }
 0x350   :  { %180 = vst [vmem:[#allocation3] sm:$0xff] %v161_v50 }
 0x351   :  { %182 = vst [vmem:[#allocation3 + $0x10] sm:$0xff] %v166_v51 }
 0x354   :  { %v170_v52 = vpop.f32.mrf.mxu2 }
 0x355   :  { %v175_v53 = vpop.f32.mrf.mxu3  ;;  %v171_v54 = vadd.f32 %v449_v47, %v170_v52  ;;  %v162_v56 = vpop.f32.mrf.mxu0 }
 0x356   :  { %v176_v55 = vadd.f32 %v449_v47, %v175_v53  ;;  %v167_v57 = vpop.f32.mrf.mxu1  ;;  %v163_v58 = vadd.f32 %v449_v47, %v162_v56 }
 0x357   :  { %v168_v59 = vadd.f32 %v449_v47, %v167_v57  ;;  %184 = vst [vmem:[#allocation3 + $0x20] sm:$0xff] %v171_v54 }
 0x358   :  { %186 = vst [vmem:[#allocation3 + $0x30] sm:$0xff] %v176_v55 }
 0x359   :  { %181 = vst [vmem:[#allocation3 + $0x8] sm:$0xff] %v163_v58 }
 0x35a   :  { %183 = vst [vmem:[#allocation3 + $0x18] sm:$0xff] %v168_v59 }
 0x35c   :  { %v172_v60 = vpop.f32.mrf.mxu2 }
 0x35d   :  { %v177_v61 = vpop.f32.mrf.mxu3  ;;  %v173_v62 = vadd.f32 %v449_v47, %v172_v60 }
 0x35e   :  { %v178_v63 = vadd.f32 %v449_v47, %v177_v61 }
 0x35f   :  { %185 = vst [vmem:[#allocation3 + $0x28] sm:$0xff] %v173_v62 }
 0x360   :  { %187 = vst [vmem:[#allocation3 + $0x38] sm:$0xff] %v178_v63 }
 0x361 LB: > { %v366_v2 = vor.u32 %v601_v46, %v596_v45  ;;  %v204_v3 = vpack.c.bf16 %v497_v1, %v497_v1  ;;  %v362_v4 = vor.u32 %v591_v44, %v586_v43  ;;  %s506_s3 = smov 32   ;;  %s358_s25 = sshll.u32 %s501_s1, 3  ;;  %s501_s1 = sphi %s606_s1, %s198_s1   ;;  %v497_v1 = vphi %v495_v1, %v496_v1   ;;  %v493_v0 = vphi %v491_v0, %v251_v0  }
 0x362   : > { %s202_s26 = scalar_lea.vmem [#allocation3], %s358_s25  ;;  %s507_s27 = smov 64  }
 0x363   : > { %229 = vmatpush.bf16.msra.mxu0 %v366_v2  ;;  %206 = vrot.lane.b32.xlu0 %v204_v3, %s506_s3  ;;  %s198_s1 = sadd.s32 1, %s501_s1  }
 0x364   : > { %p195_p1 = scmp.ge.s32.totalorder %s198_s1, 8  }
 0x365   :  { %v384_v23 = vld [vmem:[%s638_s4 + $0x8] sm:$0xff] (%p195_p1)  ;;  %s508_s30 = smov (%p195_p1), 32   ;;  %v383_v24 = vld [vmem:[%s638_s4] sm:$0xff] (%p195_p1) }
 0x366   :  { %v454_v26 = vld [vmem:[%s639_s5] ss:$0 sm:$0xff] (%p195_p1) }
 0x367   : > { %230 = vmatpush.bf16.msra.mxu0 %v362_v4  ;;  %v203_v6 = vld [vmem:[%s202_s26] sm:$0xff] }
 0x3d5   : > { %v207_v5 = vpop.permute.xlu0 %206 }
 0x3d6   : > { %367 = vmatmul.msk.bf16.vlgmr.msra.gmra.mxu0 %vm61_vm3, %v207_v5 }
 0x3d7   :  { %291 = vmatpush.bf16.msra.mxu0 (%p195_p1), %v384_v23 }
 0x3db   :  { %292 = vmatpush.bf16.msra.mxu0 (%p195_p1), %v383_v24 }
 0x453   : > { %v232_v8 = vpop.f32.mrf.mxu0 }
 0x454   : > { %v236_v9 = vadd.f32 %v232_v8, %v203_v6 }
 0x456   : > { %v237_v10 = vmul.f32 %v236_v9, %v556_v7 }
 0x458   : > { %450 = vtanh.f32 %v237_v10 }
 0x45b   : > { %v234_v11 = vpop.f32.mrf.mxu0 }
 0x45e   : > { %v451_v12 = vpop.eup %450 }
 0x45f   : > { %243 = vrot.lane.b32.xlu0 %v451_v12, %s507_s27  ;;  %v239_v13 = vmul.f32 0.5, %v451_v12 }
 0x461   : > { %v240_v14 = vadd.f32 0.5, %v239_v13 }
 0x463   : > { %v241_v17 = vmul.f32 %v493_v0, %v240_v14 }
 0x4d1   : > { %v244_v15 = vpop.permute.xlu0 %243 }
 0x4d2   : > { %v246_v16 = vmul.f32 %v244_v15, %v240_v14 }
 0x4d4   : > { %248 = vrot.lane.b32.xlu1 %v246_v16, %s506_s3 }
 0x546   : > { %v249_v18 = vpop.permute.xlu1 %248 }
 0x547   : > { %v251_v0 = vadd.f32 %v249_v18, %v241_v17  }
 0x549   : > { %452 = vtanh.f32 %v251_v0 }
 0x54f   : > { %v453_v19 = vpop.eup %452 }
 0x550   : > { %254 = vrot.lane.b32.xlu1 %v453_v19, %s507_s27 }
 0x5c1   :  { %197 = sbr.rel (!%p195_p1) target bundleno = 865 (0x361), region = 73 }
 0x5c2   : > { %v255_v20 = vpop.permute.xlu1 %254 }
 0x5c3   : > { %v257_v21 = vmul.f32 %v255_v20, %v240_v14  }
 0x5c5   : > { %v496_v1 = vmov %v257_v21   ;;  %v258_v22 = vpack.c.bf16 (%p195_p1), %v257_v21, %v257_v21 }
 0x5c7   :  { %268 = vrot.lane.b32.xlu0 %v258_v22, %s508_s30 }
 0x639   :  { %v269_v25 = vpop.permute.xlu0 %268 }
 0x63a   :  { %376 = vmatmul.msk.bf16.vlgmr.msra.gmra.mxu0 %vm61_vm3, %v269_v25 }
 0x6b7   :  { %v294_v7 = vpop.f32.mrf.mxu0 }
 0x6b8   :  { %v295_v27 = vadd.f32 %v454_v26, %v294_v7 }
 0x6ba   :  { %v298_v28 = vmax.f32 %v295_v27, 0.0 }
 0x6bc   :  { %299 = vst [vmem:[%s640_s6] sm:$0xff] %v298_v28 }
 0x6bf   :  { %v296_v29 = vpop.f32.mrf.mxu0 }

</bundles_post_ra>
